<compile_context>
chip_gen: v5e
topology: v5e:2x2
jax: 0.10.0
libtpu: 0.0.40
codegen_flags: <defaults>
</compile_context>

<pallas_src>
import numpy as np
import jax
import jax.numpy as jnp
from jax.experimental import pallas as pl
from jax.experimental.pallas import tpu as pltpu


def _disc_kernel(bias_ref, h_ref, w_ref, c_ref, out_ref):
    n_rows = c_ref.shape[0]        # N  (static)
    n_rounds = out_ref.shape[0]    # R = 1 + negsamp_round (static)

    # Shared bilinear left-product, computed once on the MXU (f32 accumulate).
    t = jnp.dot(h_ref[...], w_ref[...], preferred_element_type=jnp.float32)

    c0 = c_ref[...].astype(jnp.float32)   # round-0 context, resident in VMEM

    scores = []
    for r in range(n_rounds):              # R is small & static -> fully unrolled
        if r == 0 or n_rows <= 1:
            c_r = c0
        else:
            # Closed form of r applications of cat((x[-2:-1], x[:-1]), 0):
            #   round r == concat(c[N-1-r' : N-1, :], c[0 : N-r', :]),
            #   r' = ((r-1) mod (N-1)) + 1   (the permutation is periodic with
            #   period N-1 after round 1).  Built straight from c: no serial
            #   round-to-round dependency chain, half the vreg copy traffic.
            r_eff = (r - 1) % (n_rows - 1) + 1
            c_r = jnp.concatenate(
                [c0[n_rows - 1 - r_eff : n_rows - 1, :],
                 c0[: n_rows - r_eff, :]],
                axis=0,
            )
        # score[b] = sum_j t[b, j] * c_r[b, j]  -> lane row of length N (VPU + XLU).
        scores.append(jnp.sum(t * c_r, axis=-1))

    # One bias broadcast + one (R, N) store (instead of R broadcasts / masked stores).
    out_ref[...] = (jnp.stack(scores, axis=0) + bias_ref[0]).astype(out_ref.dtype)


def discriminator_forward(c, h_pl, weight, bias, negsamp_round,
                          matmul_dtype=jnp.bfloat16):
    """c, h_pl: (N, n_h). weight: (n_h, n_h). bias: (1,). Returns (R*N, 1) float32.

    matmul_dtype: dtype fed to the MXU for t = h_pl @ W (f32 accumulation always).
    bf16 is the fast path on v6e/v7x; pass jnp.float32 for bit-tight results.
    """
    N, n_h = c.shape
    R = 1 + negsamp_round

    h_mx = h_pl.astype(matmul_dtype)
    w_mx = weight.astype(matmul_dtype)
    c_f32 = c.astype(jnp.float32)
    bias_f32 = bias.astype(jnp.float32)

    mx_bytes = jnp.dtype(matmul_dtype).itemsize
    cost = pl.CostEstimate(
        flops=2 * N * n_h * n_h + 2 * R * N * n_h,
        transcendentals=0,
        bytes_accessed=(N * n_h + n_h * n_h) * mx_bytes   # h, W (matmul dtype)
                       + N * n_h * 4                      # c (f32)
                       + 4                                # bias
                       + R * N * 4,                       # output
    )

    # TODO(synk): when N scales up, add an N-tile "parallel" grid axis (2 TCs on v7x)
    # and size tiles against VMEM (64 MiB physical on v7x; >=512-row tiles on v5e/v6e);
    # at N=8 a single fused invocation is latency-optimal.
    # TODO(synk): batch several (c, h_pl) problems into one pallas_call (or pack 4
    # independent n_h=32 discriminators per 128-lane vreg) to amortize the fixed
    # per-call dispatch cost, which dominates at this problem size.
    out = pl.pallas_call(
        _disc_kernel,
        out_shape=jax.ShapeDtypeStruct((R, N), jnp.float32),
        in_specs=[
            pl.BlockSpec(memory_space=pltpu.SMEM),   # bias (1,)  scalar
            pl.BlockSpec(memory_space=pltpu.VMEM),   # h_pl (N, n_h)
            pl.BlockSpec(memory_space=pltpu.VMEM),   # W (n_h, n_h)
            pl.BlockSpec(memory_space=pltpu.VMEM),   # c (N, n_h)
        ],
        out_specs=pl.BlockSpec(memory_space=pltpu.VMEM),
        cost_estimate=cost,
    )(bias_f32, h_mx, w_mx, c_f32)

    # Row-major (R, N) -> (R*N, 1) matches torch.cat of the per-round score columns.
    return out.reshape(R * N, 1)


def _reference_forward(c, h_pl, weight, bias, negsamp_round):
    """Pure-JAX reference matching the PyTorch module (chained permutation)."""
    def bilinear(x1, x2):
        return jnp.einsum("bi,ij,bj->b", x1, weight, x2)[:, None] + bias[0]

    scs = [bilinear(h_pl, c)]
    c_mi = c
    for _ in range(negsamp_round):
        c_mi = jnp.concatenate([c_mi[-2:-1, :], c_mi[:-1, :]], axis=0)
        scs.append(bilinear(h_pl, c_mi))
    return jnp.concatenate(scs, axis=0)


if __name__ == "__main__":
    N = 8            # number of nodes / rows
    n_h = 32         # hidden dim of Discriminator
    negsamp_round = 2

    key = jax.random.PRNGKey(0)
    k_c, k_h, k_w = jax.random.split(key, 3)

    c = jax.random.normal(k_c, (N, n_h), dtype=jnp.float32)
    h_pl = jax.random.normal(k_h, (N, n_h), dtype=jnp.float32)

    # nn.Bilinear(n_h, n_h, 1) weight has shape (1, n_h, n_h); xavier_uniform_ on it
    # uses fan_in = n_h*n_h, fan_out = n_h  ->  bound = sqrt(6 / (fan_in + fan_out)).
    bound = float(np.sqrt(6.0 / (n_h * n_h + n_h)))
    weight = jax.random.uniform(k_w, (n_h, n_h), dtype=jnp.float32,
                                minval=-bound, maxval=bound)
    bias = jnp.zeros((1,), dtype=jnp.float32)   # bias.data.fill_(0.0)

    ref = _reference_forward(c, h_pl, weight, bias, negsamp_round)

    # Exactness check of the kernel structure (f32 MXU path): tight tolerance.
    logits_f32 = discriminator_forward(c, h_pl, weight, bias, negsamp_round,
                                       matmul_dtype=jnp.float32)
    jax.block_until_ready(logits_f32)
    assert logits_f32.shape == ((1 + negsamp_round) * N, 1)
    np.testing.assert_allclose(np.asarray(logits_f32), np.asarray(ref),
                               rtol=1e-5, atol=1e-5)

    # Default fast path (bf16 MXU inputs, f32 accumulate): loose tolerance.
    logits = discriminator_forward(c, h_pl, weight, bias, negsamp_round)
    jax.block_until_ready(logits)
    assert logits.shape == ((1 + negsamp_round) * N, 1)
    np.testing.assert_allclose(np.asarray(logits), np.asarray(ref),
                               rtol=5e-2, atol=5e-2)

    print("KERNEL_OK")
</pallas_src>

<mosaic_0001>
module attributes {stable_mosaic.version = 11 : i64} {
  func.func @_disc_kernel(%arg0: memref<1xf32, #tpu.memory_space<smem>>, %arg1: memref<8x32xf32, #tpu.memory_space<vmem>>, %arg2: memref<32x32xf32, #tpu.memory_space<vmem>>, %arg3: memref<8x32xf32, #tpu.memory_space<vmem>>, %arg4: memref<3x8xf32, #tpu.memory_space<vmem>>) attributes {dimension_semantics = [], scalar_prefetch = 0 : i64, scratch_operands = 0 : i64, tpu.core_type = #tpu.core_type<tc>} {
    %c0 = arith.constant 0 : index
    %c0_0 = arith.constant 0 : index
    %0 = vector.load %arg1[%c0, %c0_0] : memref<8x32xf32, #tpu.memory_space<vmem>>, vector<8x32xf32>
    %c0_1 = arith.constant 0 : index
    %c0_2 = arith.constant 0 : index
    %1 = vector.load %arg2[%c0_1, %c0_2] : memref<32x32xf32, #tpu.memory_space<vmem>>, vector<32x32xf32>
    %cst = arith.constant dense<0.000000e+00> : vector<8x32xf32>
    %2 = tpu.matmul %0, %1, %cst {dimension_numbers = #tpu.dot_dimension_numbers<[1], [0], [0], [1], [0, 0, 1, 1], [], []>} : vector<8x32xf32>, vector<32x32xf32>, vector<8x32xf32> -> vector<8x32xf32>
    %c0_3 = arith.constant 0 : index
    %c0_4 = arith.constant 0 : index
    %3 = vector.load %arg3[%c0_3, %c0_4] : memref<8x32xf32, #tpu.memory_space<vmem>>, vector<8x32xf32>
    %4 = arith.mulf %2, %3 : vector<8x32xf32>
    %cst_5 = arith.constant dense<0.000000e+00> : vector<8xf32>
    %5 = vector.multi_reduction <add>, %4, %cst_5 [1] : vector<8x32xf32> to vector<8xf32>
    %6 = vector.extract_strided_slice %3 {offsets = [6, 0], sizes = [1, 32], strides = [1, 1]} : vector<8x32xf32> to vector<1x32xf32>
    %7 = vector.extract_strided_slice %3 {offsets = [0, 0], sizes = [7, 32], strides = [1, 1]} : vector<8x32xf32> to vector<7x32xf32>
    %8 = tpu.concatenate %6, %7 in 0 : vector<1x32xf32>, vector<7x32xf32> -> vector<8x32xf32>
    %9 = arith.mulf %2, %8 : vector<8x32xf32>
    %cst_6 = arith.constant dense<0.000000e+00> : vector<8xf32>
    %10 = vector.multi_reduction <add>, %9, %cst_6 [1] : vector<8x32xf32> to vector<8xf32>
    %11 = vector.extract_strided_slice %3 {offsets = [5, 0], sizes = [2, 32], strides = [1, 1]} : vector<8x32xf32> to vector<2x32xf32>
    %12 = vector.extract_strided_slice %3 {offsets = [0, 0], sizes = [6, 32], strides = [1, 1]} : vector<8x32xf32> to vector<6x32xf32>
    %13 = tpu.concatenate %11, %12 in 0 : vector<2x32xf32>, vector<6x32xf32> -> vector<8x32xf32>
    %14 = arith.mulf %2, %13 : vector<8x32xf32>
    %cst_7 = arith.constant dense<0.000000e+00> : vector<8xf32>
    %15 = vector.multi_reduction <add>, %14, %cst_7 [1] : vector<8x32xf32> to vector<8xf32>
    %16 = vector.shape_cast %5 : vector<8xf32> to vector<1x8xf32>
    %17 = vector.shape_cast %10 : vector<8xf32> to vector<1x8xf32>
    %18 = vector.shape_cast %15 : vector<8xf32> to vector<1x8xf32>
    %19 = tpu.concatenate %16, %17, %18 in 0 : vector<1x8xf32>, vector<1x8xf32>, vector<1x8xf32> -> vector<3x8xf32>
    %c0_8 = arith.constant 0 : index
    %20 = memref.load %arg0[%c0_8] : memref<1xf32, #tpu.memory_space<smem>>
    %21 = vector.broadcast %20 : f32 to vector<3x8xf32>
    %22 = arith.addf %19, %21 : vector<3x8xf32>
    %c0_9 = arith.constant 0 : index
    %c0_10 = arith.constant 0 : index
    %23 = vector.load %arg4[%c0_9, %c0_10] : memref<3x8xf32, #tpu.memory_space<vmem>>, vector<3x8xf32>
    tpu.vector_store %arg4[%c0_9, %c0_10], %22 {strides = array<i32>} : memref<3x8xf32, #tpu.memory_space<vmem>>, vector<3x8xf32>,
    return
  }
}

</mosaic_0001>

<bundles_post_ra>
// kernel: tpu_custom_call.1
= control target key start
LH: loop header
LB: loop body
LE: loop exit
PB: predicated region body
PF: predicated region fallthrough
CT: control target
= control target key end

     0   :  { %10 = vsyncpa [#allocation4], 0  ;;  %s314_s0 = inlined_call_operand.<no memory space> [shape: f32[1], index: 0, kind: input, shape index: {}]   ;;  %s315_s1 = inlined_call_operand.hbm [shape: f32[8,32], index: 1, kind: input, shape index: {}]   ;;  %s316_s2 = inlined_call_operand.hbm [shape: f32[32,32], index: 2, kind: input, shape index: {}]   ;;  %s317_s3 = inlined_call_operand.hbm [shape: f32[8,32], index: 3, kind: input, shape index: {}]   ;;  %s318_s4 = inlined_call_operand.hbm [shape: f32[3,8], index: 4, kind: output, shape index: {}]  }
   0x1   :  { %11 = vsyncpa [#allocation7], 0  ;;  %s30_s17 = sshll.u32 %s316_s2, 4  ;;  %s31_s17 = int_to_ptr.hbm [resolvable:$true] %s30_s17 }
   0x2   :  { %12 = vsyncpa [#allocation5], 0  ;;  %s260_s18 = smov [#allocation6]   ;;  %s20_s22 = sshll.u32 %s315_s1, 4  ;;  %s21_s22 = int_to_ptr.hbm [resolvable:$true] %s20_s22 }
   0x3   :  { %s32_s19 = sshll.u32 %s260_s18, 4  ;;  %s261_s23 = smov 128   ;;  %s33_s19 = int_to_ptr.vmem [resolvable:$true] %s32_s19 }
   0x4   :  { %s262_s24 = smov 8   ;;  %s263_s25 = smov [#allocation3]  }
   0x5   :  { %38 = dma.hbm_to_vmem [thread:$0]  %s31_s17, 512, %s33_s19, [#allocation7], %s261_s23, %s261_s23, %s262_s24  }
   0x6   :  { %s22_s26 = sshll.u32 %s263_s25, 4  ;;  %s44_s29 = sshll.u32 %s317_s3, 4  ;;  %s23_s26 = int_to_ptr.vmem [resolvable:$true] %s22_s26  ;;  %s45_s29 = int_to_ptr.hbm [resolvable:$true] %s44_s29 }
   0x7   :  { %25 = dma.hbm_to_vmem [thread:$0]  %s21_s22, 128, %s23_s26, [#allocation4]  }
   0x8   :  { %s264_s2 = smov [#allocation8]  }
   0x9   :  { %s46_s30 = sshll.u32 %s264_s2, 4  ;;  %s47_s30 = int_to_ptr.vmem [resolvable:$true] %s46_s30 }
   0xa   :  { %49 = dma.hbm_to_vmem [thread:$0]  %s45_s29, 128, %s47_s30, [#allocation7]  }
   0xb   :  { %254 = dma.done.wait [#allocation4], 128  }
   0xc   :  { %255 = vsyncadd [#allocation4], 4294967168 }
   0xd   :  { %256 = dma.done.wait [#allocation7], 640  }
   0xe   :  { %257 = vsyncadd [#allocation7], 4294966656  ;;  %v66_v0 = vld [vmem:[#allocation6 + $0x18] sm:$0xff]  ;;  %v65_v1 = vld [vmem:[#allocation6 + $0x10] sm:$0xff]  ;;  %vm67_vm0 = vcmask 261120   ;;  %vm109_vm1 = vcmask 1041408   ;;  %v116_v19 = vlaneseq  ;;  %v129_v26 = vstv %s314_s0 }
   0xf   :  { %83 = vmatpush.msra.mxu0 %v66_v0  ;;  %v64_v2 = vld [vmem:[#allocation6 + $0x8] sm:$0xff]  ;;  %v63_v3 = vld [vmem:[#allocation6] sm:$0xff]  ;;  %v62_v4 = vld [vmem:[#allocation3] sm:$0xff]  ;;  %vm101_vm2 = vcmask 1040384   ;;  %s265_s5 = smov [#allocation9]   ;;  %s140_s9 = sshll.u32 %s318_s4, 4  ;;  %s141_s9 = int_to_ptr.hbm [resolvable:$true] %s140_s9 }
  0x10   :  { %v91_v5 = vld [vmem:[#allocation8] sm:$0xff]  ;;  %v117_v20 = vand.u32 127, %v116_v19  ;;  %s138_s6 = sshll.u32 %s265_s5, 4  ;;  %vm131_vm3 = vcmask 59392   ;;  %s139_s6 = int_to_ptr.vmem [resolvable:$true] %s138_s6 }
  0x11   :  { %84 = vmatpush.msra.mxu0 %v65_v1  ;;  %v97_v6 = vrot.slane %v91_v5, 6  ;;  %v107_v7 = vrot.slane %v91_v5, 5  ;;  %v99_v10 = vrot.slane %v91_v5, 7 }
  0x13   :  { %85 = vmatpush.msra.mxu0 %v64_v2  ;;  %v110_v8 = vsel %vm109_vm1, %v107_v7, %v97_v6  ;;  %v102_v15 = vsel %vm101_vm2, %v97_v6, %v99_v10 }
  0x15   :  { %86 = vmatpush.msra.mxu0 %v63_v3 }
  0x16   :  { %151 = vmatmul.msk.f32.vlgmr.msra.gmra.mxu0 %vm67_vm0, %v62_v4 }
  0x93   :  { %v88_v9 = vpop.f32.mrf.mxu0 }
  0x94   :  { %v111_v11 = vmul.f32 %v110_v8, %v88_v9  ;;  %v92_v12 = vmul.f32 %v91_v5, %v88_v9  ;;  %v103_v16 = vmul.f32 %v102_v15, %v88_v9 }
  0x96   :  { %v112_v13 = vsel %vm67_vm0, %v111_v11, 0.0  ;;  %v93_v14 = vsel %vm67_vm0, %v92_v12, 0.0  ;;  %v104_v17 = vsel %vm67_vm0, %v103_v16, 0.0 }
  0x97   :  { %113 = vadd.xlane.f32.xlu1 %v112_v13  ;;  %94 = vadd.xlane.f32.xlu0 %v93_v14 }
  0x9f   :  { %105 = vadd.xlane.f32.xlu0 %v104_v17 }
 0x10a   :  { %v95_v18 = vpop.xlane.xlu0 %94  ;;  %v114_v21 = vpop.xlane.xlu1 %113 }
 0x10b   :  { %v118_v23 = vperm.slane %v95_v18, %v117_v20  ;;  %v124_v25 = vperm.slane %v114_v21, %v117_v20 }
 0x112   :  { %v106_v22 = vpop.xlane.xlu0 %105 }
 0x113   :  { %v121_v24 = vperm.slane %v106_v22, %v117_v20 }
 0x115   :  { %v126_v27 = vsel %vm101_vm2, %v118_v23, %v121_v24 }
 0x116   :  { %v127_v28 = vsel %vm109_vm1, %v126_v27, %v124_v25 }
 0x117   :  { %v130_v29 = vadd.f32 %v129_v26, %v127_v28 }
 0x119   :  { %132 = vst.msk [vmem:[#allocation9] sm:$0x7] %vm131_vm3, %v130_v29 }
 0x11a   :  { %143 = dma.vmem_to_hbm [thread:$0]  %s139_s6, 64, %s141_s9, [#allocation5]  }
 0x11b   :  { %258 = dma.done.wait [#allocation5], 64  }
 0x11c   :  { %259 = vsyncadd [#allocation5], 4294967232 }
 0x11d   :  { %148 = vsyncpa [#allocation4], 1 }
 0x11e   :  { %149 = vsyncpa [#allocation7], 1 }
 0x11f   :  { %150 = vsyncpa [#allocation5], 1 }

</bundles_post_ra>
